<compile_context>
chip_gen: v5e
topology: v5e:2x2
jax: 0.10.0
libtpu: 0.0.40
codegen_flags: <defaults>
</compile_context>

<pallas_src>
import functools
import math

import jax
import jax.numpy as jnp
from jax.experimental import pallas as pl
from jax.experimental.pallas import tpu as pltpu

DROPOUT_P = 0.1


def _attention_kernel(x_ref, w_ref, drop_ref, o_ref, *, use_approx_recip):
    # x_ref: (BB, S, E) f32   w_ref: (E, 3E) bf16   drop_ref: (BB, S, S) f32
    bb, s, e = x_ref.shape
    x = x_ref[...].astype(jnp.bfloat16)

    # Fused QKV projection: single wide MXU matmul with M = BB*S rows.
    qkv = jnp.dot(x.reshape(bb * s, e), w_ref[...],
                  preferred_element_type=jnp.float32)          # (BB*S, 3E) f32
    qkv = qkv.reshape(bb, s, 3 * e)

    scale = 1.0 / math.sqrt(e)
    q = (qkv[:, :, :e] * scale).astype(jnp.bfloat16)           # fold 1/sqrt(E) into q
    k = qkv[:, :, e:2 * e].astype(jnp.bfloat16)
    v = qkv[:, :, 2 * e:].astype(jnp.bfloat16)

    # QK^T as a batched contraction on the feature axis (no materialized k.T).
    scores = jnp.einsum("bqd,bkd->bqk", q, k,
                        preferred_element_type=jnp.float32)    # (BB, S, S) f32

    # Causal mask: query i attends to keys j <= i.
    row = jax.lax.broadcasted_iota(jnp.int32, (s, s), 0)
    col = jax.lax.broadcasted_iota(jnp.int32, (s, s), 1)
    scores = jnp.where((col <= row)[None, :, :], scores, jnp.float32(-1e30))

    # Numerically stable softmax (f32).
    m = jnp.max(scores, axis=-1, keepdims=True)
    p_un = jnp.exp(scores - m)
    denom = jnp.sum(p_un, axis=-1, keepdims=True)
    if use_approx_recip:
        inv = pl.reciprocal(denom, approx=True)   # EUP slot on real TPU
    else:
        inv = 1.0 / denom                         # portable (CPU / interpret) path
    probs = p_un * inv

    # Dropout on attention weights; mask already carries the 1/(1-p) scale.
    probs = probs * drop_ref[...]

    out = jnp.einsum("bqk,bkd->bqd", probs.astype(jnp.bfloat16), v,
                     preferred_element_type=jnp.float32)       # (BB, S, E) f32
    o_ref[...] = out.astype(o_ref.dtype)


def fuse_qkv_weights(wq, wk, wv):
    """Fuse torch-layout (E_out, E_in) Linear weights into one (E, 3E) bf16
    matrix.  Call ONCE at init time so no transpose sits on the hot path."""
    return jnp.concatenate([wq.T, wk.T, wv.T], axis=1).astype(jnp.bfloat16)


def _pick_batch_block(batch, seq):
    """Batch items per grid step so the projection M-dim is ~>= 128 rows."""
    bb = min(batch, max(1, -(-128 // seq)))
    while batch % bb:
        bb -= 1
    return bb


@functools.partial(jax.jit, static_argnames=("dropout_p",))
def head_attention(x, w_qkv, dropout_key, dropout_p=DROPOUT_P):
    """x: (B, S, E) f32; w_qkv: fused (E, 3E) bf16 weight; dropout_key: PRNGKey."""
    B, S, E = x.shape
    assert w_qkv.shape == (E, 3 * E)

    # Dropout keep/scale mask precomputed with the JAX PRNG (the in-kernel HW
    # PRNG has no CPU/interpret lowering).  Values are 0 or 1/(1-p).
    keep = jax.random.bernoulli(dropout_key, 1.0 - dropout_p, (B, S, S))
    drop_mask = keep.astype(jnp.float32) * (1.0 / (1.0 - dropout_p))

    bb = _pick_batch_block(B, S)
    grid = (B // bb,)
    use_approx = jax.default_backend() == "tpu"
    kernel = functools.partial(_attention_kernel, use_approx_recip=use_approx)

    return pl.pallas_call(
        kernel,
        out_shape=jax.ShapeDtypeStruct((B, S, E), x.dtype),
        grid_spec=pltpu.PrefetchScalarGridSpec(
            num_scalar_prefetch=0,
            grid=grid,
            in_specs=[
                pl.BlockSpec((bb, S, E), lambda b: (b, 0, 0)),       # x block
                pl.BlockSpec((E, 3 * E), lambda b: (0, 0)),          # fused W_qkv
                pl.BlockSpec((bb, S, S), lambda b: (b, 0, 0)),       # dropout mask
            ],
            out_specs=pl.BlockSpec((bb, S, E), lambda b: (b, 0, 0)),
        ),
        compiler_params=pltpu.CompilerParams(
            dimension_semantics=("parallel",),
        ),
    )(x, w_qkv, drop_mask)


if __name__ == "__main__":
    B, S, E = 2, 8, 32

    root = jax.random.PRNGKey(0)
    kx, kq, kk, kv, kdrop = jax.random.split(root, 5)

    x = jax.random.normal(kx, (B, S, E), dtype=jnp.float32)

    # torch.nn.Linear default init: U(-1/sqrt(fan_in), 1/sqrt(fan_in)),
    # weight shape (out_features, in_features).
    bound = 1.0 / math.sqrt(E)
    wq = jax.random.uniform(kq, (E, E), jnp.float32, -bound, bound)
    wk = jax.random.uniform(kk, (E, E), jnp.float32, -bound, bound)
    wv = jax.random.uniform(kv, (E, E), jnp.float32, -bound, bound)

    w_qkv = fuse_qkv_weights(wq, wk, wv)   # init-time, once (not per forward)

    out = head_attention(x, w_qkv, kdrop, dropout_p=DROPOUT_P)
    out = jax.block_until_ready(out)

    assert out.shape == (B, S, E)
    assert bool(jnp.all(jnp.isfinite(out)))
    print("KERNEL_OK")
</pallas_src>

<mosaic_0001>
module attributes {stable_mosaic.version = 11 : i64} {
  func.func @_attention_kernel(%arg0: i32, %arg1: memref<2x8x32xf32, #tpu.memory_space<vmem>>, %arg2: memref<32x96xbf16, #tpu.memory_space<vmem>>, %arg3: memref<2x8x8xf32, #tpu.memory_space<vmem>>, %arg4: memref<2x8x32xf32, #tpu.memory_space<vmem>>) attributes {dimension_semantics = [#tpu.dimension_semantics<parallel>], iteration_bounds = array<i64: 1>, scalar_prefetch = 0 : i64, scratch_operands = 0 : i64, tpu.core_type = #tpu.core_type<tc>, window_params = [{transform_indices = @transform_0, window_bounds = array<i64: 2, 8, 32>}, {pipeline_mode = #tpu.pipeline_mode<synchronous>, transform_indices = @transform_1, window_bounds = array<i64: 32, 96>}, {transform_indices = @transform_2, window_bounds = array<i64: 2, 8, 8>}, {transform_indices = @transform_3, window_bounds = array<i64: 2, 8, 32>}]} {
    %c0 = arith.constant 0 : index
    %c0_0 = arith.constant 0 : index
    %c0_1 = arith.constant 0 : index
    %0 = vector.load %arg1[%c0, %c0_0, %c0_1] : memref<2x8x32xf32, #tpu.memory_space<vmem>>, vector<2x8x32xf32>
    %1 = arith.truncf %0 : vector<2x8x32xf32> to vector<2x8x32xbf16>
    %2 = vector.shape_cast %1 : vector<2x8x32xbf16> to vector<16x32xbf16>
    %c0_2 = arith.constant 0 : index
    %c0_3 = arith.constant 0 : index
    %3 = vector.load %arg2[%c0_2, %c0_3] : memref<32x96xbf16, #tpu.memory_space<vmem>>, vector<32x96xbf16>
    %cst = arith.constant dense<0.000000e+00> : vector<16x96xf32>
    %4 = tpu.matmul %2, %3, %cst {dimension_numbers = #tpu.dot_dimension_numbers<[1], [0], [0], [1], [0, 0, 1, 1], [], []>} : vector<16x32xbf16>, vector<32x96xbf16>, vector<16x96xf32> -> vector<16x96xf32>
    %5 = vector.shape_cast %4 : vector<16x96xf32> to vector<2x8x96xf32>
    %6 = vector.extract_strided_slice %5 {offsets = [0, 0, 0], sizes = [2, 8, 32], strides = [1, 1, 1]} : vector<2x8x96xf32> to vector<2x8x32xf32>
    %cst_4 = arith.constant 0.176776692 : f32
    %7 = vector.broadcast %cst_4 : f32 to vector<2x8x32xf32>
    %8 = arith.mulf %6, %7 : vector<2x8x32xf32>
    %9 = arith.truncf %8 : vector<2x8x32xf32> to vector<2x8x32xbf16>
    %10 = vector.extract_strided_slice %5 {offsets = [0, 0, 32], sizes = [2, 8, 32], strides = [1, 1, 1]} : vector<2x8x96xf32> to vector<2x8x32xf32>
    %11 = arith.truncf %10 : vector<2x8x32xf32> to vector<2x8x32xbf16>
    %12 = vector.extract_strided_slice %5 {offsets = [0, 0, 64], sizes = [2, 8, 32], strides = [1, 1, 1]} : vector<2x8x96xf32> to vector<2x8x32xf32>
    %13 = arith.truncf %12 : vector<2x8x32xf32> to vector<2x8x32xbf16>
    "tpu.trace_start"() <{level = 10 : i32, message = "bqd,bkd->bqk"}> : () -> ()
    %cst_5 = arith.constant dense<0.000000e+00> : vector<2x8x8xf32>
    %14 = tpu.matmul %9, %11, %cst_5 {dimension_numbers = #tpu.dot_dimension_numbers<[2], [2], [1], [1], [0, 0, 0, 1, 1, 1], [0], [0]>} : vector<2x8x32xbf16>, vector<2x8x32xbf16>, vector<2x8x8xf32> -> vector<2x8x8xf32>
    "tpu.trace_stop"() : () -> ()
    %15 = tpu.iota {dimensions = array<i32: 0>} : vector<8x8xi32>
    %16 = tpu.iota {dimensions = array<i32: 1>} : vector<8x8xi32>
    %17 = arith.cmpi sle, %16, %15 : vector<8x8xi32>
    %18 = vector.shape_cast %17 : vector<8x8xi1> to vector<1x8x8xi1>
    %cst_6 = arith.constant -1.000000e+30 : f32
    %19 = vector.shape_cast %18 : vector<1x8x8xi1> to vector<1x8x8xi1>
    %20 = vector.broadcast %19 : vector<1x8x8xi1> to vector<2x8x8xi1>
    %21 = vector.broadcast %cst_6 : f32 to vector<2x8x8xf32>
    %22 = arith.select %20, %14, %21 : vector<2x8x8xi1>, vector<2x8x8xf32>
    %cst_7 = arith.constant dense<0xFF800000> : vector<2x8xf32>
    %23 = vector.multi_reduction <maximumf>, %22, %cst_7 [2] : vector<2x8x8xf32> to vector<2x8xf32>
    %24 = vector.shape_cast %23 : vector<2x8xf32> to vector<2x8x1xf32>
    %25 = vector.broadcast %24 : vector<2x8x1xf32> to vector<2x8x8xf32>
    %26 = arith.subf %22, %25 : vector<2x8x8xf32>
    %27 = math.exp %26 : vector<2x8x8xf32>
    %cst_8 = arith.constant dense<0.000000e+00> : vector<2x8xf32>
    %28 = vector.multi_reduction <add>, %27, %cst_8 [2] : vector<2x8x8xf32> to vector<2x8xf32>
    %29 = vector.shape_cast %28 : vector<2x8xf32> to vector<2x8x1xf32>
    %cst_9 = arith.constant 1.000000e+00 : f32
    %30 = vector.broadcast %cst_9 : f32 to vector<2x8x1xf32>
    %31 = arith.divf %30, %29 : vector<2x8x1xf32>
    %32 = vector.broadcast %31 : vector<2x8x1xf32> to vector<2x8x8xf32>
    %33 = arith.mulf %27, %32 : vector<2x8x8xf32>
    %c0_10 = arith.constant 0 : index
    %c0_11 = arith.constant 0 : index
    %c0_12 = arith.constant 0 : index
    %34 = vector.load %arg3[%c0_10, %c0_11, %c0_12] : memref<2x8x8xf32, #tpu.memory_space<vmem>>, vector<2x8x8xf32>
    %35 = arith.mulf %33, %34 : vector<2x8x8xf32>
    %36 = arith.truncf %35 : vector<2x8x8xf32> to vector<2x8x8xbf16>
    "tpu.trace_start"() <{level = 10 : i32, message = "bqk,bkd->bqd"}> : () -> ()
    %cst_13 = arith.constant dense<0.000000e+00> : vector<2x8x32xf32>
    %37 = tpu.matmul %36, %13, %cst_13 {dimension_numbers = #tpu.dot_dimension_numbers<[2], [1], [1], [2], [0, 0, 0, 1, 1, 2], [0], [0]>} : vector<2x8x8xbf16>, vector<2x8x32xbf16>, vector<2x8x32xf32> -> vector<2x8x32xf32>
    "tpu.trace_stop"() : () -> ()
    %c0_14 = arith.constant 0 : index
    %c0_15 = arith.constant 0 : index
    %c0_16 = arith.constant 0 : index
    %38 = vector.load %arg4[%c0_14, %c0_15, %c0_16] : memref<2x8x32xf32, #tpu.memory_space<vmem>>, vector<2x8x32xf32>
    tpu.vector_store %arg4[%c0_14, %c0_15, %c0_16], %37 {strides = array<i32>} : memref<2x8x32xf32, #tpu.memory_space<vmem>>, vector<2x8x32xf32>,
    return
  }
  func.func @transform_0(%arg0: i32) -> (i32, i32, i32) {
    %c0_i32 = arith.constant 0 : i32
    %c0_i32_0 = arith.constant 0 : i32
    %c0_i32_1 = arith.constant 0 : i32
    return %arg0, %c0_i32, %c0_i32_0 : i32, i32, i32
  }
  func.func @transform_1(%arg0: i32) -> (i32, i32) {
    %c0_i32 = arith.constant 0 : i32
    %c0_i32_0 = arith.constant 0 : i32
    %c0_i32_1 = arith.constant 0 : i32
    return %c0_i32, %c0_i32_0 : i32, i32
  }
  func.func @transform_2(%arg0: i32) -> (i32, i32, i32) {
    %c0_i32 = arith.constant 0 : i32
    %c0_i32_0 = arith.constant 0 : i32
    %c0_i32_1 = arith.constant 0 : i32
    return %arg0, %c0_i32, %c0_i32_0 : i32, i32, i32
  }
  func.func @transform_3(%arg0: i32) -> (i32, i32, i32) {
    %c0_i32 = arith.constant 0 : i32
    %c0_i32_0 = arith.constant 0 : i32
    %c0_i32_1 = arith.constant 0 : i32
    return %arg0, %c0_i32, %c0_i32_0 : i32, i32, i32
  }
}

</mosaic_0001>

<bundles_post_ra>
// kernel: head_attention.1
= control target key start
LH: loop header
LB: loop body
LE: loop exit
PB: predicated region body
PF: predicated region fallthrough
CT: control target
= control target key end

     0   :  { %s359_s0 = inlined_call_operand.vmem [shape: f32[2,8,32], index: 0, kind: input, shape index: {}]   ;;  %s360_s1 = inlined_call_operand.vmem [shape: bf16[32,96], index: 1, kind: input, shape index: {}]   ;;  %s361_s2 = inlined_call_operand.vmem [shape: f32[2,8,8], index: 2, kind: input, shape index: {}]   ;;  %s362_s3 = inlined_call_operand.hbm [shape: f32[2,8,32], index: 3, kind: output, shape index: {}]  }
   0x1   :  { %v256_v0 = vld [vmem:[%s360_s1 + $0x8] sm:$0xff]  ;;  %v16_v1 = vld [vmem:[%s359_s0] sm:$0xff] }
   0x2   :  { %v17_v2 = vld [vmem:[%s359_s0 + $0x8] sm:$0xff]  ;;  %v18_v3 = vpack.c.bf16 %v16_v1, %v16_v1 }
   0x3   :  { %8 = vsyncpa [#allocation3], 0  ;;  %51 = vmatpush.bf16.msra.mxu0 %v256_v0  ;;  %v255_v4 = vld [vmem:[%s360_s1] sm:$0xff]  ;;  %v19_v5 = vpack.c.bf16 %v17_v2, %v17_v2  ;;  %vm41_vm0 = vcmask 261120   ;;  %s296_s0 = smov 96   ;;  %s297_s1 = smov 64   ;;  %v113_v27 = vlaneseq }
   0x4   :  { %v26_v6 = vunpack.c.l.b16 %v18_v3  ;;  %vm184_vm1 = vcmask 1043456   ;;  %vm122_vm3 = vcmask 64512   ;;  %v173_v62 = vld [vmem:[%s361_s2] sm:$0xff]  ;;  %s298_s24 = smov [#allocation2]   ;;  %s230_s28 = sshll.u32 %s362_s3, 4  ;;  %s231_s28 = int_to_ptr.hbm [resolvable:$true] %s230_s28 }
   0x5   :  { %v27_v7 = vunpack.c.l.b16 %v19_v5  ;;  %v114_v28 = vshrl.u32 %v113_v27, 7  ;;  %v116_v29 = vand.u32 127, %v113_v27  ;;  %s228_s25 = sshll.u32 %s298_s24, 4  ;;  %s300_s29 = smov 8   ;;  %s229_s25 = int_to_ptr.vmem [resolvable:$true] %s228_s25 }
   0x7   :  { %52 = vmatpush.bf16.msra.mxu0 %v255_v4  ;;  %v28_v8 = vpack.c.b16 %v27_v7, %v26_v6  ;;  %vm117_vm2 = vcmp.le.s32.totalorder %v116_v29, %v114_v28 }
   0xa   :  { %250 = vmatmul.msk.bf16.vlgmr.msra.gmra.mxu0 %vm41_vm0, %v28_v8 }
  0x87   :  { %v54_v9 = vpop.f32.mrf.mxu0 }
  0x88   :  { %v63_v10 = vpack.c.bf16 %v54_v9, %v54_v9  ;;  %v59_v19 = vmul.f32 0.17677669, %v54_v9 }
  0x8a   :  { %v66_v11 = vunpack.c.l.b16 %v63_v10  ;;  %v61_v20 = vpack.c.bf16 %v59_v19, %v59_v19 }
  0x8c   :  { %v67_v12 = vpack.c.b16 %v66_v11, %v66_v11 }
  0x8e   :  { %68 = vrot.lane.b32.xlu0 %v67_v12, %s296_s0 }
  0x8f   :  { %v56_v13 = vpop.f32.mrf.mxu0 }
  0x90   :  { %v64_v14 = vpack.c.bf16 %v56_v13, %v56_v13  ;;  %v60_v23 = vmul.f32 0.17677669, %v56_v13 }
  0x92   :  { %v90_v15 = vunpack.c.l.b16 %v64_v14  ;;  %v62_v24 = vpack.c.bf16 %v60_v23, %v60_v23 }
  0x94   :  { %v91_v16 = vpack.c.b16 %v90_v15, %v90_v15 }
  0x96   :  { %92 = vrot.lane.b32.xlu0 %v91_v16, %s296_s0 }
  0x9e   :  { %179 = vrot.lane.b32.xlu0 %v67_v12, %s297_s1  ;;  %v174_v12 = vld [vmem:[%s361_s2 + $0x8] sm:$0xff]  ;;  %s299_s2 = smov 128  }
 0x100   :  { %v69_v17 = vpop.permute.xlu0 %68 }
 0x101   :  { %v74_v18 = vsel %vm41_vm0, %v69_v17, 0 }
 0x102   :  { %83 = vmatpush.bf16.xpose.msra.mxu1 %v74_v18 }
 0x108   :  { %v93_v21 = vpop.permute.xlu0 %92 }
 0x109   :  { %251 = vmatmul.msk.bf16.vlgmr.msra.gmra.mxu1 %vm41_vm0, %v61_v20  ;;  %v98_v22 = vsel %vm41_vm0, %v93_v21, 0 }
 0x10a   :  { %107 = vmatpush.bf16.xpose.msra.mxu2 %v98_v22 }
 0x110   :  { %v180_v25 = vpop.permute.xlu0 %179 }
 0x111   :  { %252 = vmatmul.msk.bf16.vlgmr.msra.gmra.mxu2 %vm41_vm0, %v62_v24  ;;  %v186_v26 = vsel %vm184_vm1, %v180_v25, 0 }
 0x112   :  { %195 = vmatpush.bf16.msra.mxu3 %v186_v26 }
 0x186   :  { %v85_v30 = vpop.f32.mrf.mxu1 }
 0x187   :  { %v120_v31 = vsel %vm117_vm2, %v85_v30, -1e+30 }
 0x188   :  { %v123_v32 = vsel %vm122_vm3, %v120_v31, -inf }
 0x189   :  { %124 = vmax.xlane.f32.xlu1 %v123_v32 }
 0x18e   :  { %v87_v33 = vpop.f32.mrf.mxu1 }
 0x194   :  { %v109_v34 = vpop.f32.mrf.mxu2 }
 0x195   :  { %v121_v35 = vsel %vm117_vm2, %v109_v34, -1e+30 }
 0x196   :  { %v126_v36 = vsel %vm122_vm3, %v121_v35, -inf }
 0x197   :  { %127 = vmax.xlane.f32.xlu1 %v126_v36 }
 0x19c   :  { %v111_v37 = vpop.f32.mrf.mxu2 }
 0x1b0   :  { %201 = vrot.lane.b32.xlu1 %v91_v16, %s297_s1 }
 0x1fc   :  { %v125_v38 = vpop.xlane.xlu1 %124 }
 0x1fd   :  { %v129_v39 = vsub.f32 %v120_v31, %v125_v38 }
 0x1ff   :  { %v131_v40 = vmul.f32 1.442695, %v129_v39 }
 0x201   :  { %262 = vpow2.f32 %v131_v40 }
 0x207   :  { %v263_v41 = vpop.eup %262 }
 0x208   :  { %v135_v42 = vsel %vm122_vm3, %v263_v41, 0.0 }
 0x209   :  { %136 = vadd.xlane.f32.xlu2 %v135_v42 }
 0x20a   :  { %v128_v43 = vpop.xlane.xlu1 %127 }
 0x20b   :  { %v130_v44 = vsub.f32 %v121_v35, %v128_v43 }
 0x20d   :  { %v133_v45 = vmul.f32 1.442695, %v130_v44 }
 0x20f   :  { %264 = vpow2.f32 %v133_v45 }
 0x215   :  { %v265_v46 = vpop.eup %264 }
 0x216   :  { %v138_v47 = vsel %vm122_vm3, %v265_v46, 0.0 }
 0x217   :  { %139 = vadd.xlane.f32.xlu2 %v138_v47 }
 0x222   :  { %v202_v48 = vpop.permute.xlu1 %201 }
 0x223   :  { %v207_v49 = vsel %vm184_vm1, %v202_v48, 0 }
 0x224   :  { %216 = vmatpush.bf16.msrb.mxu3 %v207_v49 }
 0x27c   :  { %v137_v50 = vpop.xlane.xlu2 %136 }
 0x27d   :  { %266 = vrcp.f32 %v137_v50  ;;  %v152_v54 = vand.u32 2147483648, %v137_v50  ;;  %v150_v56 = vand.u32 2147483647, %v137_v50  ;;  %vm146_vm5 = vweird.f32 %v137_v50 }
 0x27f   :  { %v153_v59 = vor.u32 1.1754944e-38, %v152_v54  ;;  %vm151_vm7 = vcmp.eq.f32.partialorder %v150_v56, 8.507059e+37 }
 0x283   :  { %v267_v51 = vpop.eup %266 }
 0x284   :  { %v142_v52 = vmul.f32 %v267_v51, %v137_v50  ;;  %vm147_vm4 = vweird.f32 %v267_v51 }
 0x285   :  { %vm148_vm6 = vmor %vm146_vm5, %vm147_vm4 }
 0x286   :  { %v143_v53 = vsub.f32 1.0, %v142_v52 }
 0x288   :  { %v144_v55 = vmul.f32 %v267_v51, %v143_v53 }
 0x28a   :  { %v145_v57 = vadd.f32 %v267_v51, %v144_v55  ;;  %v140_v58 = vpop.xlane.xlu2 %139 }
 0x28b   :  { %268 = vrcp.f32 %v140_v58  ;;  %v167_v5 = vand.u32 2147483648, %v140_v58  ;;  %v165_v7 = vand.u32 2147483647, %v140_v58  ;;  %vm161_vm9 = vweird.f32 %v140_v58 }
 0x28c   :  { %v149_v60 = vsel %vm148_vm6, %v267_v51, %v145_v57 }
 0x28d   :  { %v154_v61 = vsel %vm151_vm7, %v153_v59, %v149_v60  ;;  %v168_v9 = vor.u32 1.1754944e-38, %v167_v5  ;;  %vm166_vm11 = vcmp.eq.f32.partialorder %v165_v7, 8.507059e+37 }
 0x28e   :  { %v171_v63 = vmul.f32 %v263_v41, %v154_v61 }
 0x290   :  { %v175_v0 = vmul.f32 %v173_v62, %v171_v63 }
 0x291   :  { %v269_v1 = vpop.eup %268 }
 0x292   :  { %v157_v2 = vmul.f32 %v269_v1, %v140_v58  ;;  %v177_v3 = vpack.c.bf16 %v175_v0, %v175_v0  ;;  %vm162_vm8 = vweird.f32 %v269_v1 }
 0x293   :  { %vm163_vm10 = vmor %vm161_vm9, %vm162_vm8 }
 0x294   :  { %v158_v4 = vsub.f32 1.0, %v157_v2  ;;  %253 = vmatmul.msk.bf16.vlgmr.msra.gmra.mxu3 %vm122_vm3, %v177_v3 }
 0x296   :  { %v159_v6 = vmul.f32 %v269_v1, %v158_v4 }
 0x298   :  { %v160_v8 = vadd.f32 %v269_v1, %v159_v6 }
 0x29a   :  { %v164_v10 = vsel %vm163_vm10, %v269_v1, %v160_v8 }
 0x29b   :  { %v169_v11 = vsel %vm166_vm11, %v168_v9, %v164_v10 }
 0x29c   :  { %v172_v13 = vmul.f32 %v265_v46, %v169_v11 }
 0x29e   :  { %v176_v14 = vmul.f32 %v174_v12, %v172_v13 }
 0x2a0   :  { %v178_v15 = vpack.c.bf16 %v176_v14, %v176_v14 }
 0x2a4   :  { %254 = vmatmul.msk.bf16.vlgmr.msrb.gmra.mxu3 %vm122_vm3, %v178_v15 }
 0x317   :  { %v197_v16 = vpop.f32.mrf.mxu3 }
 0x318   :  { %222 = vst.msk [vmem:[#allocation2] sm:$0xff] %vm41_vm0, %v197_v16 }
 0x31f   :  { %v199_v17 = vpop.f32.mrf.mxu3 }
 0x327   :  { %v218_v18 = vpop.f32.mrf.mxu3 }
 0x328   :  { %223 = vst.msk [vmem:[#allocation2 + $0x8] sm:$0xff] %vm41_vm0, %v218_v18 }
 0x329   :  { %236 = dma.vmem_to_hbm [thread:$0]  %s229_s25, 256, %s231_s28, [#allocation3], %s299_s2, %s299_s2, %s300_s29  }
 0x32f   :  { %v220_v19 = vpop.f32.mrf.mxu3 }
 0x330   :  { %294 = dma.done.wait [#allocation3], 256  }
 0x331   :  { %295 = vsyncadd [#allocation3], 4294967040 }
 0x332   :  { %241 = vsyncpa [#allocation3], 1 }

</bundles_post_ra>
